<compile_context>
chip_gen: v7x
topology: tpu7x:2x2x1
jax: 0.10.0
libtpu: 0.0.40
codegen_flags: <defaults>
</compile_context>

<pallas_src>
import numpy as np
import jax
import jax.numpy as jnp
from jax import lax
from jax.experimental import pallas as pl
from jax.experimental.pallas import tpu as pltpu

N_CLASSES = 8
LANE = 128
MAX_TILE = 65536   # (8, 65536) f32 logits block = 2 MiB/buffer; fits every generation

# Deterministic weight matrix from the module's __init__ (normalized by its max).
_WEIGHT_MATRIX = np.array(
    [[0, 1, 6, 10, 10, 10, 10, 10],
     [1, 0, 3, 10, 10, 10, 10, 10],
     [6, 3, 0, 2, 9, 10, 10, 10],
     [10, 10, 2, 0, 9, 9, 10, 10],
     [10, 10, 9, 9, 0, 8, 8, 8],
     [10, 10, 10, 9, 8, 0, 9, 8],
     [10, 10, 10, 10, 8, 9, 0, 9],
     [10, 10, 10, 10, 8, 8, 9, 0]], dtype=np.float64)
_WEIGHT_MATRIX = (_WEIGHT_MATRIX / _WEIGHT_MATRIX.max()).astype(np.float32)


def _wce_kernel(logits_ref, tgt_ref, w_ref, out_ref):
    # logits_ref: (8, T)   classes on sublanes, samples on lanes (native dtype)
    # tgt_ref:    (1, T)   int32 true labels; padded lanes hold sentinel N_CLASSES
    # w_ref:      (8, 8)   f32 normalized weight matrix (resident across grid steps)
    # out_ref:    (8, 128) f32 resident accumulator (every element holds the running sum)
    j = pl.program_id(0)

    @pl.when(j == 0)
    def _init():
        out_ref[...] = jnp.zeros_like(out_ref)

    logits = logits_ref[...]                 # native dtype; compare-only below
    c, t = logits.shape
    tgt = tgt_ref[...]                       # (1, T) int32

    cls = lax.broadcasted_iota(jnp.int32, (c, t), 0)       # class id per sublane

    # argmax over the class (sublane) axis; first-max tie-break matches np.argmax.
    mx = jnp.max(logits, axis=0, keepdims=True)            # (1, T)
    pred = jnp.min(jnp.where(logits >= mx, cls, jnp.int32(c)),
                   axis=0, keepdims=True)                  # (1, T)

    # One-hot of the prediction (built directly in f32), W-row gather on the MXU:
    #   wg[r, s] = sum_k W[r, k] * onehot[k, s] = W[r, pred_s]
    onehot = jnp.where(cls == pred, jnp.float32(1.0), jnp.float32(0.0))   # (8, T)
    wg = jnp.dot(w_ref[...], onehot, preferred_element_type=jnp.float32)  # (8, T)

    # Pick the true-class row: per-sample contribution W[tgt_s, pred_s].
    # Padded lanes carry tgt == N_CLASSES, which never matches -> contribute exactly 0.
    w_val = jnp.where(cls == tgt, wg, 0.0)                 # (8, T)

    # Per-tile partial sum accumulated into the resident block ((1,1) broadcasts over
    # (8,128)).  f32 scalar accumulation: relative error ~ n_tiles * eps, fine for
    # any realistic N.
    w_row = jnp.sum(w_val, axis=0, keepdims=True)          # (1, T)
    out_ref[...] += jnp.sum(w_row, axis=1, keepdims=True)  # (1, 1)


def weighted_cross_error(logits, targets):
    """logits: (N, C=8) float, targets: (N,) int in [0, C). Returns scalar f32."""
    n, c = logits.shape
    assert c == N_CLASSES

    # Split N evenly into <=MAX_TILE tiles, rounded to the 128-lane granule, so
    # padding is at most 127 samples per tile.
    n_tiles = max(1, -(-n // MAX_TILE))
    per_tile = -(-n // n_tiles)
    tile = -(-per_tile // LANE) * LANE
    n_pad = n_tiles * tile

    # Lane-dense layout: batch on lanes, 8 classes on sublanes.  Logits keep their
    # native dtype (bf16 stays bf16); targets padded with the N_CLASSES sentinel so
    # padded samples contribute zero without any in-kernel mask.
    # NOTE: this transpose is one extra XLA HBM pass over the logits; eliminating it
    # would require an in-lane segmented argmax on the natural (N, 8) layout.
    lt = jnp.transpose(logits)                               # (8, N)
    tt = targets.astype(jnp.int32).reshape(1, n)             # (1, N)
    if n_pad != n:
        lt = jnp.pad(lt, ((0, 0), (0, n_pad - n)))
        tt = jnp.pad(tt, ((0, 0), (0, n_pad - n)), constant_values=N_CLASSES)
    w = jnp.asarray(_WEIGHT_MATRIX)

    out = pl.pallas_call(
        _wce_kernel,
        out_shape=jax.ShapeDtypeStruct((N_CLASSES, LANE), jnp.float32),
        grid_spec=pltpu.PrefetchScalarGridSpec(
            num_scalar_prefetch=0,
            grid=(n_tiles,),
            in_specs=[
                pl.BlockSpec((N_CLASSES, tile), lambda j: (0, j)),
                pl.BlockSpec((1, tile), lambda j: (0, j)),
                pl.BlockSpec((N_CLASSES, N_CLASSES), lambda j: (0, 0)),
            ],
            out_specs=pl.BlockSpec((N_CLASSES, LANE), lambda j: (0, 0)),
        ),
        compiler_params=pltpu.CompilerParams(
            dimension_semantics=("arbitrary",),
            vmem_limit_bytes=48 * 1024 * 1024),
    )(lt, tt, w)

    # The accumulator block is constant-filled; any element holds the total sum.
    return out[0, 0] / jnp.float32(n)


def _reference(logits, targets):
    # Pure numpy reference mirroring the PyTorch module.
    x = np.asarray(logits, dtype=np.float64)
    e = np.exp(x - x.max(axis=1, keepdims=True))
    p = e / e.sum(axis=1, keepdims=True)
    y_pred = np.argmax(p, axis=1)
    y_true = np.asarray(targets)
    conf = np.zeros((N_CLASSES, N_CLASSES), dtype=np.float64)
    for t, pr in zip(y_true, y_pred):
        conf[t, pr] += 1
    return float((conf * _WEIGHT_MATRIX).sum() / len(y_true))


if __name__ == "__main__":
    key = jax.random.PRNGKey(0)
    k1, k2 = jax.random.split(key)
    N = 16
    logits = jax.random.normal(k1, (N, N_CLASSES), dtype=jnp.float32)
    targets = jax.random.randint(k2, (N,), 0, N_CLASSES, dtype=jnp.int32)

    err = weighted_cross_error(logits, targets)
    err = jax.block_until_ready(err)

    ref = _reference(logits, targets)
    assert abs(float(err) - ref) < 1e-5, (float(err), ref)
    print("KERNEL_OK")
</pallas_src>

<mosaic_0001>
module attributes {stable_mosaic.version = 11 : i64} {
  func.func @_wce_kernel(%arg0: i32, %arg1: memref<8x128xf32, #tpu.memory_space<vmem>>, %arg2: memref<1x128xi32, #tpu.memory_space<vmem>>, %arg3: memref<8x8xf32, #tpu.memory_space<vmem>>, %arg4: memref<8x128xf32, #tpu.memory_space<vmem>>) attributes {dimension_semantics = [#tpu.dimension_semantics<arbitrary>], iteration_bounds = array<i64: 1>, scalar_prefetch = 0 : i64, scratch_operands = 0 : i64, tpu.core_type = #tpu.core_type<tc>, window_params = [{transform_indices = @transform_0, window_bounds = array<i64: 8, 128>}, {transform_indices = @transform_1, window_bounds = array<i64: 1, 128>}, {pipeline_mode = #tpu.pipeline_mode<synchronous>, transform_indices = @transform_2, window_bounds = array<i64: 8, 8>}, {pipeline_mode = #tpu.pipeline_mode<synchronous>, transform_indices = @transform_3, window_bounds = array<i64: 8, 128>}]} {
    %c0_i32 = arith.constant 0 : i32
    %0 = arith.cmpi eq, %arg0, %c0_i32 : i32
    %1 = arith.extui %0 : i1 to i32
    %c0_i32_0 = arith.constant 0 : i32
    %2 = arith.cmpi ne, %1, %c0_i32_0 : i32
    scf.if %2 {
      %cst_17 = arith.constant 0.000000e+00 : f32
      %33 = vector.broadcast %cst_17 : f32 to vector<8x128xf32>
      %c0_18 = arith.constant 0 : index
      %c0_19 = arith.constant 0 : index
      %34 = vector.load %arg4[%c0_18, %c0_19] : memref<8x128xf32, #tpu.memory_space<vmem>>, vector<8x128xf32>
      tpu.vector_store %arg4[%c0_18, %c0_19], %33 {strides = array<i32>} : memref<8x128xf32, #tpu.memory_space<vmem>>, vector<8x128xf32>,
    } else {
    }
    %c0 = arith.constant 0 : index
    %c0_1 = arith.constant 0 : index
    %3 = vector.load %arg1[%c0, %c0_1] : memref<8x128xf32, #tpu.memory_space<vmem>>, vector<8x128xf32>
    %c0_2 = arith.constant 0 : index
    %c0_3 = arith.constant 0 : index
    %4 = vector.load %arg2[%c0_2, %c0_3] : memref<1x128xi32, #tpu.memory_space<vmem>>, vector<1x128xi32>
    %5 = tpu.iota {dimensions = array<i32: 0>} : vector<8x128xi32>
    %cst = arith.constant dense<0xFF800000> : vector<128xf32>
    %6 = vector.multi_reduction <maximumf>, %3, %cst [0] : vector<8x128xf32> to vector<128xf32>
    %7 = vector.shape_cast %6 : vector<128xf32> to vector<1x128xf32>
    %8 = vector.broadcast %7 : vector<1x128xf32> to vector<8x128xf32>
    %9 = arith.cmpf oge, %3, %8 : vector<8x128xf32>
    %c8_i32 = arith.constant 8 : i32
    %10 = vector.broadcast %c8_i32 : i32 to vector<8x128xi32>
    %11 = arith.select %9, %5, %10 : vector<8x128xi1>, vector<8x128xi32>
    %cst_4 = arith.constant dense<2147483647> : vector<128xi32>
    %12 = vector.multi_reduction <minsi>, %11, %cst_4 [0] : vector<8x128xi32> to vector<128xi32>
    %13 = vector.shape_cast %12 : vector<128xi32> to vector<1x128xi32>
    %14 = vector.broadcast %13 : vector<1x128xi32> to vector<8x128xi32>
    %15 = arith.cmpi eq, %5, %14 : vector<8x128xi32>
    %cst_5 = arith.constant 1.000000e+00 : f32
    %cst_6 = arith.constant 0.000000e+00 : f32
    %16 = vector.broadcast %cst_5 : f32 to vector<8x128xf32>
    %17 = vector.broadcast %cst_6 : f32 to vector<8x128xf32>
    %18 = arith.select %15, %16, %17 : vector<8x128xi1>, vector<8x128xf32>
    %c0_7 = arith.constant 0 : index
    %c0_8 = arith.constant 0 : index
    %19 = vector.load %arg3[%c0_7, %c0_8] : memref<8x8xf32, #tpu.memory_space<vmem>>, vector<8x8xf32>
    %cst_9 = arith.constant dense<0.000000e+00> : vector<8x128xf32>
    %20 = tpu.matmul %19, %18, %cst_9 {dimension_numbers = #tpu.dot_dimension_numbers<[1], [0], [0], [1], [0, 0, 1, 1], [], []>} : vector<8x8xf32>, vector<8x128xf32>, vector<8x128xf32> -> vector<8x128xf32>
    %21 = vector.broadcast %4 : vector<1x128xi32> to vector<8x128xi32>
    %22 = arith.cmpi eq, %5, %21 : vector<8x128xi32>
    %cst_10 = arith.constant 0.000000e+00 : f32
    %23 = vector.broadcast %cst_10 : f32 to vector<8x128xf32>
    %24 = arith.select %22, %20, %23 : vector<8x128xi1>, vector<8x128xf32>
    %cst_11 = arith.constant dense<0.000000e+00> : vector<128xf32>
    %25 = vector.multi_reduction <add>, %24, %cst_11 [0] : vector<8x128xf32> to vector<128xf32>
    %26 = vector.shape_cast %25 : vector<128xf32> to vector<1x128xf32>
    %c0_12 = arith.constant 0 : index
    %c0_13 = arith.constant 0 : index
    %27 = vector.load %arg4[%c0_12, %c0_13] : memref<8x128xf32, #tpu.memory_space<vmem>>, vector<8x128xf32>
    %cst_14 = arith.constant dense<0.000000e+00> : vector<1xf32>
    %28 = vector.multi_reduction <add>, %26, %cst_14 [1] : vector<1x128xf32> to vector<1xf32>
    %29 = vector.shape_cast %28 : vector<1xf32> to vector<1x1xf32>
    %30 = vector.broadcast %29 : vector<1x1xf32> to vector<8x128xf32>
    %31 = arith.addf %27, %30 : vector<8x128xf32>
    %c0_15 = arith.constant 0 : index
    %c0_16 = arith.constant 0 : index
    %32 = vector.load %arg4[%c0_15, %c0_16] : memref<8x128xf32, #tpu.memory_space<vmem>>, vector<8x128xf32>
    tpu.vector_store %arg4[%c0_15, %c0_16], %31 {strides = array<i32>} : memref<8x128xf32, #tpu.memory_space<vmem>>, vector<8x128xf32>,
    return
  }
  func.func @transform_0(%arg0: i32) -> (i32, i32) {
    %c0_i32 = arith.constant 0 : i32
    %c0_i32_0 = arith.constant 0 : i32
    return %c0_i32, %arg0 : i32, i32
  }
  func.func @transform_1(%arg0: i32) -> (i32, i32) {
    %c0_i32 = arith.constant 0 : i32
    %c0_i32_0 = arith.constant 0 : i32
    return %c0_i32, %arg0 : i32, i32
  }
  func.func @transform_2(%arg0: i32) -> (i32, i32) {
    %c0_i32 = arith.constant 0 : i32
    %c0_i32_0 = arith.constant 0 : i32
    %c0_i32_1 = arith.constant 0 : i32
    return %c0_i32, %c0_i32_0 : i32, i32
  }
  func.func @transform_3(%arg0: i32) -> (i32, i32) {
    %c0_i32 = arith.constant 0 : i32
    %c0_i32_0 = arith.constant 0 : i32
    %c0_i32_1 = arith.constant 0 : i32
    return %c0_i32, %c0_i32_0 : i32, i32
  }
}

</mosaic_0001>

<bundles_post_ra>
// kernel: tpu_custom_call.1
= control target key start
LH: loop header
LB: loop body
LE: loop exit
PB: predicated region body
PF: predicated region fallthrough
CT: control target
= control target key end

     0   :  { %8 = vsyncpa [#allocation3], 0  ;;  %s328_s0 = inlined_call_operand.hbm [shape: f32[8,128], index: 0, kind: input, shape index: {}]   ;;  %s329_s1 = inlined_call_operand.vmem [shape: s32[1,128], index: 1, kind: input, shape index: {}]   ;;  %s330_s2 = inlined_call_operand.hbm [shape: f32[8,8], index: 2, kind: input, shape index: {}]   ;;  %s331_s3 = inlined_call_operand.hbm [shape: f32[8,128], index: 3, kind: output, shape index: {}]  }
   0x1   :  { %9 = vsyncpa [#allocation6], 0 }
   0x2   :  { %10 = vsyncpa [#allocation4], 0  ;;  %s263_s12 = smov [#allocation2]   ;;  %s264_s14 = smov [#allocation5]  }
   0x3   :  { %s17_s13 = sshll.u32 %s263_s12, 4  ;;  %s29_s15 = sshll.u32 %s264_s14, 4  ;;  %s18_s13 = int_to_ptr.vmem [resolvable:$true] %s17_s13  ;;  %s30_s15 = int_to_ptr.vmem [resolvable:$true] %s29_s15 }
   0x4   :  { %s191_s18 = scalar_lea.hbm %s328_s0, 128 }
   0x5   :  { %p192_p0 = scmp.ne.s32.totalorder %s328_s0, %s191_s18  ;;  %p195_p1 = scmp.lt.u32.totalorder %s191_s18, %s328_s0 }
   0x7   :  { %p197_p2 = pnand %p195_p1, %p192_p0 }
   0x9   :  { %200 = shalt.err (!%p197_p2)
}
   0xa   :  { %s201_s23 = scalar_lea.vmem %s18_s13, 128  ;;  %p206_p4 = scmp.lt.s32.totalorder %s18_s13, %s18_s13 }
   0xb   :  { %p202_p3 = scmp.ne.s32.totalorder %s18_s13, %s201_s23  ;;  %p207_p5 = scmp.lt.s32.totalorder %s201_s23, %s201_s23 }
   0xd   :  { %p208_p6 = por %p207_p5, %p206_p4 }
   0xf   :  { %p209_p7 = pnand %p208_p6, %p202_p3 }
  0x11   :  { %212 = shalt.err (!%p209_p7)
}
  0x12   :  { %20 = dma.hbm_to_vmem [thread:$0]  %s328_s0, 128, %s18_s13, [#allocation3]  }
  0x13   :  { %s213_s28 = scalar_lea.hbm %s330_s2, 128 }
  0x14   :  { %p214_p8 = scmp.ne.s32.totalorder %s330_s2, %s213_s28  ;;  %p217_p9 = scmp.lt.u32.totalorder %s213_s28, %s330_s2 }
  0x16   :  { %p219_p10 = pnand %p217_p9, %p214_p8 }
  0x18   :  { %222 = shalt.err (!%p219_p10)
}
  0x19   :  { %s223_s6 = scalar_lea.vmem %s30_s15, 128  ;;  %p228_p12 = scmp.lt.s32.totalorder %s30_s15, %s30_s15 }
  0x1a   :  { %p224_p11 = scmp.ne.s32.totalorder %s30_s15, %s223_s6  ;;  %p229_p13 = scmp.lt.s32.totalorder %s223_s6, %s223_s6 }
  0x1c   :  { %p230_p0 = por %p229_p13, %p228_p12 }
  0x1e   :  { %p231_p1 = pnand %p230_p0, %p224_p11 }
  0x20   :  { %234 = shalt.err (!%p231_p1)
}
  0x21   :  { %32 = dma.hbm_to_vmem [thread:$0]  %s330_s2, 128, %s30_s15, [#allocation6]  }
  0x22   :  { %257 = dma.done.wait [#allocation3], 128  }
  0x23   :  { %258 = vsyncadd [#allocation3], 4294967168 }
  0x24   :  { %259 = dma.done.wait [#allocation6], 128  }
  0x25   :  { %260 = vsyncadd [#allocation6], 4294967168  ;;  %v265_v0 = vmov 0.0   ;;  %vm266_vm0 = vmmov 0   ;;  %v44_v1 = vld [vmem:[#allocation2] sm:$0xff]  ;;  %v46_v5 = vlaneseq  ;;  %v67_v17 = vld [vmem:[#allocation5] sm:$0xff] }
  0x26   :  { %180 = vmatprep.subr.mxu0 %v265_v0  ;;  %182 = vmatprep.mubr.msk.f32.mxu0 %vm266_vm0, %v265_v0  ;;  %v48_v2 = vrot.slane %v44_v1, 4  ;;  %vm68_vm5 = vcmask 64512   ;;  %v267_v18 = vmov 1.0   ;;  %v177_v19 = vld [vmem:[%s329_s1] ss:$0 sm:$0xff]  ;;  %s268_s9 = smov [#allocation7]  }
  0x27   :  { %v47_v8 = vshrl.u32 %v46_v5, 7  ;;  %s165_s10 = sshll.u32 %s268_s9, 4  ;;  %s166_s10 = int_to_ptr.vmem [resolvable:$true] %s165_s10 }
  0x28   :  { %v49_v3 = vmax.f32 %v44_v1, %v48_v2  ;;  %s235_s11 = scalar_lea.vmem %s166_s10, 128  ;;  %p240_p3 = scmp.lt.s32.totalorder %s166_s10, %s166_s10 }
  0x29   :  { %vm146_vm7 = vcmp.eq.s32.totalorder %v47_v8, %v177_v19  ;;  %p236_p2 = scmp.ne.s32.totalorder %s166_s10, %s235_s11  ;;  %p241_p4 = scmp.lt.s32.totalorder %s235_s11, %s235_s11 }
  0x2a   :  { %v50_v4 = vrot.slane %v49_v3, 2 }
  0x2b   :  { %p242_p5 = por %p241_p4, %p240_p3 }
  0x2c   :  { %v51_v6 = vmax.f32 %v49_v3, %v50_v4 }
  0x2d   :  { %p243_p6 = pnand %p242_p5, %p236_p2 }
  0x2e   :  { %v52_v7 = vrot.slane %v51_v6, 1 }
  0x30   :  { %v53_v9 = vmax.f32 %v51_v6, %v52_v7 }
  0x32   :  { %vm54_vm1 = vcmp.ge.f32.partialorder %v44_v1, %v53_v9 }
  0x33   :  { %v55_v10 = vsel %vm54_vm1, %v47_v8, 8 }
  0x34   :  { %v56_v11 = vrot.slane %v55_v10, 4 }
  0x36   :  { %vm57_vm2 = vcmp.lt.s32.totalorder %v55_v10, %v56_v11 }
  0x37   :  { %v58_v12 = vsel %vm57_vm2, %v55_v10, %v56_v11 }
  0x38   :  { %v59_v13 = vrot.slane %v58_v12, 2 }
  0x3a   :  { %vm60_vm3 = vcmp.lt.s32.totalorder %v58_v12, %v59_v13 }
  0x3b   :  { %v61_v14 = vsel %vm60_vm3, %v58_v12, %v59_v13 }
  0x3c   :  { %v62_v15 = vrot.slane %v61_v14, 1 }
  0x3e   :  { %vm63_vm4 = vcmp.lt.s32.totalorder %v61_v14, %v62_v15 }
  0x3f   :  { %v64_v16 = vsel %vm63_vm4, %v61_v14, %v62_v15 }
  0x40   :  { %vm65_vm6 = vcmp.eq.s32.totalorder %v47_v8, %v64_v16 }
  0x41   :  { %181 = vmatpush3.msk.msra.mxu0 %vm65_vm6, %v267_v18 }
  0x42   :  { %183 = vmatmul.mubr.msk.f32.vlgmr.msra.gmra.mrb[0].mxu0 %vm68_vm5, %v67_v17 }
 0x115   :  { %v138_v20 = vpop.f32.mrb[0].mxu0 }
 0x116   :  { %v147_v21 = vsel %vm146_vm7, %v138_v20, 0.0  ;;  %v184_v22 = vpop.f32.mrb[1].mxu0 }
 0x117   :  { %v148_v23 = vrot.slane %v147_v21, 4 }
 0x119   :  { %v149_v24 = vadd.f32 %v148_v23, %v147_v21 }
 0x11b   :  { %v150_v25 = vrot.slane %v149_v24, 2 }
 0x11d   :  { %v151_v26 = vadd.f32 %v150_v25, %v149_v24 }
 0x11f   :  { %v152_v27 = vrot.slane %v151_v26, 1 }
 0x121   :  { %v153_v28 = vadd.f32 %v152_v27, %v151_v26 }
 0x123   :  { %155 = vadd.xlane.f32.xlu0 %v153_v28 }
 0x1b0   :  { %v156_v29 = vpop.xlane.xlu0 %155 }
 0x1b1   :  { %158 = vst [vmem:[#allocation7] sm:$0xff] %v156_v29 }
 0x1b2   :  { %246 = shalt.err (!%p243_p6)
}
 0x1b3   :  { %s247_s13 = scalar_lea.hbm %s331_s3, 128 }
 0x1b4   :  { %p248_p7 = scmp.ne.s32.totalorder %s331_s3, %s247_s13  ;;  %p251_p8 = scmp.lt.u32.totalorder %s247_s13, %s331_s3 }
 0x1b6   :  { %p253_p9 = pnand %p251_p8, %p248_p7 }
 0x1b8   :  { %256 = shalt.err (!%p253_p9)
}
 0x1b9   :  { %168 = dma.vmem_to_hbm [thread:$0]  %s166_s10, 128, %s331_s3, [#allocation4]  }
 0x1ba   :  { %261 = dma.done.wait [#allocation4], 128  }
 0x1bb   :  { %262 = vsyncadd [#allocation4], 4294967168 }
 0x1bc   :  { %172 = vsyncpa [#allocation3], 1 }
 0x1bd   :  { %173 = vsyncpa [#allocation6], 1 }
 0x1be   :  { %174 = vsyncpa [#allocation4], 1 }

</bundles_post_ra>
